<compile_context>
chip_gen: v7x
topology: tpu7x:2x2x1
jax: 0.10.0
libtpu: 0.0.40
codegen_flags: <defaults>
</compile_context>

<pallas_src>
import functools
import math

import jax
import jax.numpy as jnp
from jax import lax
from jax.experimental import pallas as pl
from jax.experimental.pallas import tpu as pltpu


def _round_up(x, m):
    return ((x + m - 1) // m) * m


def _label_smoothing_kernel(x_ref, tgt_ref, out_ref, *, n_rows, tile_n, size,
                            padding_idx, confidence, smooth_val):
    # x_ref:   (tile_n, size) f32/bf16 log-probs
    # tgt_ref: (tile_n, 1)    int32 target class per row
    # out_ref: (8, 128)       f32 per-block partial of S = sum(td * x) over valid rows
    conf_f = jnp.float32(confidence)
    smooth_f = jnp.float32(smooth_val)

    tgt = tgt_ref[...]                                        # (tile_n, 1)
    # Row validity: real row (grid may be ragged in rows) and target != padding_idx.
    valid = tgt != padding_idx
    if n_rows % tile_n != 0:
        row0 = pl.program_id(0) * tile_n
        row_idx = row0 + lax.broadcasted_iota(jnp.int32, (tile_n, 1), 0)
        valid = jnp.logical_and(valid, row_idx < n_rows)

    nfull = size // 128
    tail = size - nfull * 128

    # Full 128-lane chunks: per-chunk load/compute/fold keeps live temporaries to a few
    # vregs.  td per element is a single select: confidence at the target column,
    # smooth_val elsewhere, 0 at the padding column (only in the chunk that contains it).
    if nfull > 0:
        lane = lax.broadcasted_iota(jnp.int32, (tile_n, 128), 1)   # hoisted (no re-broadcast)
        acc = jnp.zeros((tile_n, 128), jnp.float32)
        for c in range(nfull):
            base = c * 128
            xc = x_ref[:, base:base + 128].astype(jnp.float32)
            w = jnp.where(lane == (tgt - base), conf_f, smooth_f)
            if base <= padding_idx < base + 128:                    # true_dist[:, pad] = 0
                w = jnp.where(lane == (padding_idx - base), 0.0, w)
            acc = acc + w * xc
        acc = jnp.where(valid, acc, 0.0)                            # row mask, once, on the fold
        partial = jnp.sum(acc.reshape(tile_n // 8, 8, 128), axis=0)  # (8, 128)
    else:
        partial = jnp.zeros((8, 128), jnp.float32)

    # Ragged class-dim tail (size % 128 != 0): reduced once per block, merged into lane 0.
    if tail > 0:
        base = nfull * 128
        lane_t = lax.broadcasted_iota(jnp.int32, (tile_n, tail), 1)
        xt = x_ref[:, base:size].astype(jnp.float32)
        wt = jnp.where(lane_t == (tgt - base), conf_f, smooth_f)
        if base <= padding_idx < size:
            wt = jnp.where(lane_t == (padding_idx - base), 0.0, wt)
        trow = jnp.sum(wt * xt, axis=1, keepdims=True)              # (tile_n, 1)
        trow = jnp.where(valid, trow, 0.0)
        tfold = jnp.sum(trow.reshape(tile_n // 8, 8, 1), axis=0)    # (8, 1)
        lane_o = lax.broadcasted_iota(jnp.int32, (8, 128), 1)
        partial = partial + jnp.where(lane_o == 0, tfold, jnp.float32(0.0))

    out_ref[...] = partial


def _vmem_budget():
    """(vmem_limit_bytes, x_double_buffer_budget_bytes), generation-aware."""
    cap = None
    try:
        info = pltpu.get_tpu_info()
        for attr in ("vmem_capacity_bytes", "vmem_size_bytes", "vmem_bytes"):
            v = getattr(info, attr, None)
            if v:
                cap = int(v)
                break
    except Exception:
        cap = None
    if cap is None:
        cap = 64 * 1024 * 1024                 # conservative: v7x per-TensorCore VMEM
    if cap >= 128 * 1024 * 1024:               # v5e / v6e: 128 MiB physical
        return 96 * 1024 * 1024, 64 * 1024 * 1024
    limit = min(48 * 1024 * 1024, (cap * 3) // 4)   # v7x: 64 MiB per TC, leave headroom
    return limit, max(8 * 1024 * 1024, limit - 8 * 1024 * 1024)


def label_smoothing_loss(x, target, *, size, padding_idx, smoothing=0.0,
                         max_tile_n=4096):
    """x: (N, size) f32/bf16 log-probs; target: (N,) int class ids. Returns f32 scalar."""
    # TODO(synk): the module's self.true_dist side-effect buffer is not materialized;
    # only the scalar KLDivLoss(reduction='sum') forward value is produced.
    assert x.ndim == 2 and x.shape[1] == size
    assert size > 2, "size must be > 2 (smoothing mass spread over size-2 classes)"
    assert 0 <= padding_idx < size
    N, V = x.shape

    confidence = 1.0 - smoothing
    smooth_val = smoothing / (size - 2)
    # sum_j td_j * log(td_j) per valid row is a trace-time constant (xlogy(0, .) == 0).
    row_const = 0.0
    if confidence > 0.0:
        row_const += confidence * math.log(confidence)
    if smooth_val > 0.0:
        row_const += (size - 2) * smooth_val * math.log(smooth_val)

    vmem_limit, x_budget = _vmem_budget()

    # Row tile: biggest that fits the double-buffered x tile plus bounded in-kernel
    # f32 temporaries; multiple of 16 so both f32 (8,128) and bf16 (16,128) tilings hold.
    itemsize = jnp.dtype(x.dtype).itemsize
    lanes = _round_up(V, 128)                         # VMEM lane-padded width
    per_row = 2 * lanes * itemsize + 6 * 128 * 4
    cap_rows = max(16, (x_budget // per_row) // 16 * 16)
    tile_n = max(16, min(_round_up(max_tile_n, 16), cap_rows, _round_up(N, 16)))
    # Give v7x's two TensorCores at least two independent blocks when rows allow it.
    if pl.cdiv(N, tile_n) == 1 and N > 16:
        tile_n = max(16, _round_up(pl.cdiv(N, 2), 16))
    num_blocks = pl.cdiv(N, tile_n)

    tgt2d = target.astype(jnp.int32).reshape(N, 1)

    kernel = functools.partial(
        _label_smoothing_kernel,
        n_rows=N, tile_n=tile_n, size=size, padding_idx=padding_idx,
        confidence=confidence, smooth_val=smooth_val)

    partials = pl.pallas_call(
        kernel,
        out_shape=jax.ShapeDtypeStruct((num_blocks * 8, 128), jnp.float32),
        grid_spec=pltpu.PrefetchScalarGridSpec(
            num_scalar_prefetch=0,
            grid=(num_blocks,),
            in_specs=[
                # Last dim == full class dim: no HBM-side padding copy, Mosaic masks the
                # lane tail; ragged last row block is masked in-kernel.
                pl.BlockSpec((tile_n, V), lambda i: (i, 0)),
                pl.BlockSpec((tile_n, 1), lambda i: (i, 0)),
            ],
            out_specs=pl.BlockSpec((8, 128), lambda i: (i, 0)),
        ),
        compiler_params=pltpu.CompilerParams(
            dimension_semantics=("parallel",),      # independent blocks -> dual-TC on v7x
            vmem_limit_bytes=vmem_limit),
    )(x, tgt2d)

    s = jnp.sum(partials)                                      # sum over valid rows of td*x
    n_valid = jnp.sum((target != padding_idx).astype(jnp.float32))
    return jnp.float32(row_const) * n_valid - s


def _reference(x, target, *, size, padding_idx, smoothing):
    # pure-JAX reference mirroring the PyTorch module
    confidence = 1.0 - smoothing
    N, V = x.shape
    td = jnp.full((N, V), smoothing / (size - 2), dtype=jnp.float32)
    td = td.at[jnp.arange(N), target].set(confidence)
    td = td.at[:, padding_idx].set(0.0)
    td = jnp.where((target == padding_idx)[:, None], 0.0, td)
    pos = td > 0
    kl = jnp.where(pos, td * (jnp.log(jnp.where(pos, td, 1.0)) - x), 0.0)
    return jnp.sum(kl)


if __name__ == "__main__":
    key = jax.random.PRNGKey(0)

    # --- primary small case: N=16, size=32, padding_idx=0 -------------------------
    N, size = 16, 32
    padding_idx = 0
    smoothing = 0.1
    kx, kt, kx2, kt2 = jax.random.split(key, 4)
    logits = jax.random.normal(kx, (N, size), dtype=jnp.float32)
    x = jax.nn.log_softmax(logits, axis=-1)                 # KLDivLoss expects log-probs
    target = jax.random.randint(kt, (N,), 0, size, dtype=jnp.int32)
    target = target.at[3].set(padding_idx)                  # exercise the row-mask path

    loss = jax.block_until_ready(label_smoothing_loss(
        x, target, size=size, padding_idx=padding_idx, smoothing=smoothing))
    ref = _reference(x, target, size=size, padding_idx=padding_idx, smoothing=smoothing)
    assert jnp.allclose(loss, ref, rtol=1e-5, atol=1e-5), (loss, ref)

    # smoothing == 0 (xlogy(0) = 0) path
    loss0 = jax.block_until_ready(label_smoothing_loss(
        x, target, size=size, padding_idx=padding_idx, smoothing=0.0))
    ref0 = _reference(x, target, size=size, padding_idx=padding_idx, smoothing=0.0)
    assert jnp.allclose(loss0, ref0, rtol=1e-5, atol=1e-5), (loss0, ref0)

    # bf16 log-probs path (halves HBM bytes; accumulation stays f32 in-kernel)
    x_bf16 = x.astype(jnp.bfloat16)
    loss_bf = jax.block_until_ready(label_smoothing_loss(
        x_bf16, target, size=size, padding_idx=padding_idx, smoothing=smoothing))
    ref_bf = _reference(x_bf16.astype(jnp.float32), target, size=size,
                        padding_idx=padding_idx, smoothing=smoothing)
    assert jnp.allclose(loss_bf, ref_bf, rtol=1e-4, atol=1e-4), (loss_bf, ref_bf)

    # --- ragged case: N, size not multiples of 16/128 (row mask + class tail path) --
    N2, size2, pad2 = 100, 200, 7
    logits2 = jax.random.normal(kx2, (N2, size2), dtype=jnp.float32)
    x2 = jax.nn.log_softmax(logits2, axis=-1)
    target2 = jax.random.randint(kt2, (N2,), 0, size2, dtype=jnp.int32)
    target2 = target2.at[5].set(pad2)
    loss2 = jax.block_until_ready(label_smoothing_loss(
        x2, target2, size=size2, padding_idx=pad2, smoothing=smoothing))
    ref2 = _reference(x2, target2, size=size2, padding_idx=pad2, smoothing=smoothing)
    assert jnp.allclose(loss2, ref2, rtol=1e-4, atol=1e-4), (loss2, ref2)

    print("KERNEL_OK")
</pallas_src>

<mosaic_0001>
module attributes {stable_mosaic.version = 11 : i64} {
  func.func @_label_smoothing_kernel(%arg0: i32, %arg1: memref<16x32xf32, #tpu.memory_space<vmem>>, %arg2: memref<16x1xi32, #tpu.memory_space<vmem>>, %arg3: memref<8x128xf32, #tpu.memory_space<vmem>>) attributes {dimension_semantics = [#tpu.dimension_semantics<parallel>], iteration_bounds = array<i64: 1>, scalar_prefetch = 0 : i64, scratch_operands = 0 : i64, tpu.core_type = #tpu.core_type<tc>, window_params = [{transform_indices = @transform_0, window_bounds = array<i64: 16, 32>}, {transform_indices = @transform_1, window_bounds = array<i64: 16, 1>}, {transform_indices = @transform_2, window_bounds = array<i64: 8, 128>}]} {
    %c0 = arith.constant 0 : index
    %c0_0 = arith.constant 0 : index
    %0 = vector.load %arg2[%c0, %c0_0] : memref<16x1xi32, #tpu.memory_space<vmem>>, vector<16x1xi32>
    %c0_i32 = arith.constant 0 : i32
    %1 = vector.broadcast %c0_i32 : i32 to vector<16x1xi32>
    %2 = arith.cmpi ne, %0, %1 : vector<16x1xi32>
    %cst = arith.constant 0.000000e+00 : f32
    %3 = vector.broadcast %cst : f32 to vector<8x128xf32>
    %4 = tpu.iota {dimensions = array<i32: 1>} : vector<16x32xi32>
    %c0_1 = arith.constant 0 : index
    %c0_2 = arith.constant 0 : index
    %5 = vector.load %arg1[%c0_1, %c0_2] : memref<16x32xf32, #tpu.memory_space<vmem>>, vector<16x32xf32>
    %c0_i32_3 = arith.constant 0 : i32
    %6 = vector.broadcast %c0_i32_3 : i32 to vector<16x1xi32>
    %7 = arith.subi %0, %6 : vector<16x1xi32>
    %8 = vector.broadcast %7 : vector<16x1xi32> to vector<16x32xi32>
    %9 = arith.cmpi eq, %4, %8 : vector<16x32xi32>
    %cst_4 = arith.constant 0.899999976 : f32
    %cst_5 = arith.constant 0.00333333341 : f32
    %10 = vector.broadcast %cst_4 : f32 to vector<16x32xf32>
    %11 = vector.broadcast %cst_5 : f32 to vector<16x32xf32>
    %12 = arith.select %9, %10, %11 : vector<16x32xi1>, vector<16x32xf32>
    %c0_i32_6 = arith.constant 0 : i32
    %13 = vector.broadcast %c0_i32_6 : i32 to vector<16x32xi32>
    %14 = arith.cmpi eq, %4, %13 : vector<16x32xi32>
    %cst_7 = arith.constant 0.000000e+00 : f32
    %15 = vector.broadcast %cst_7 : f32 to vector<16x32xf32>
    %16 = arith.select %14, %15, %12 : vector<16x32xi1>, vector<16x32xf32>
    %17 = arith.mulf %16, %5 : vector<16x32xf32>
    %cst_8 = arith.constant dense<0.000000e+00> : vector<16xf32>
    %18 = vector.multi_reduction <add>, %17, %cst_8 [1] : vector<16x32xf32> to vector<16xf32>
    %19 = vector.shape_cast %18 : vector<16xf32> to vector<16x1xf32>
    %cst_9 = arith.constant 0.000000e+00 : f32
    %20 = vector.broadcast %cst_9 : f32 to vector<16x1xf32>
    %21 = arith.select %2, %19, %20 : vector<16x1xi1>, vector<16x1xf32>
    %22 = vector.shape_cast %21 : vector<16x1xf32> to vector<2x8x1xf32>
    %cst_10 = arith.constant dense<0.000000e+00> : vector<8x1xf32>
    %23 = vector.multi_reduction <add>, %22, %cst_10 [0] : vector<2x8x1xf32> to vector<8x1xf32>
    %24 = tpu.iota {dimensions = array<i32: 1>} : vector<8x128xi32>
    %c0_i32_11 = arith.constant 0 : i32
    %25 = vector.broadcast %c0_i32_11 : i32 to vector<8x128xi32>
    %26 = arith.cmpi eq, %24, %25 : vector<8x128xi32>
    %cst_12 = arith.constant 0.000000e+00 : f32
    %27 = vector.shape_cast %23 : vector<8x1xf32> to vector<8x1xf32>
    %28 = vector.broadcast %27 : vector<8x1xf32> to vector<8x128xf32>
    %29 = vector.broadcast %cst_12 : f32 to vector<8x128xf32>
    %30 = arith.select %26, %28, %29 : vector<8x128xi1>, vector<8x128xf32>
    %31 = arith.addf %3, %30 : vector<8x128xf32>
    %c0_13 = arith.constant 0 : index
    %c0_14 = arith.constant 0 : index
    %32 = vector.load %arg3[%c0_13, %c0_14] : memref<8x128xf32, #tpu.memory_space<vmem>>, vector<8x128xf32>
    tpu.vector_store %arg3[%c0_13, %c0_14], %31 {strides = array<i32>} : memref<8x128xf32, #tpu.memory_space<vmem>>, vector<8x128xf32>,
    return
  }
  func.func @transform_0(%arg0: i32) -> (i32, i32) {
    %c0_i32 = arith.constant 0 : i32
    %c0_i32_0 = arith.constant 0 : i32
    return %arg0, %c0_i32 : i32, i32
  }
  func.func @transform_1(%arg0: i32) -> (i32, i32) {
    %c0_i32 = arith.constant 0 : i32
    %c0_i32_0 = arith.constant 0 : i32
    return %arg0, %c0_i32 : i32, i32
  }
  func.func @transform_2(%arg0: i32) -> (i32, i32) {
    %c0_i32 = arith.constant 0 : i32
    %c0_i32_0 = arith.constant 0 : i32
    return %arg0, %c0_i32 : i32, i32
  }
}

</mosaic_0001>

<bundles_post_ra>
// kernel: tpu_custom_call.1
= control target key start
LH: loop header
LB: loop body
LE: loop exit
PB: predicated region body
PF: predicated region fallthrough
CT: control target
= control target key end

     0   :  { %v98_v1 = vmov 0   ;;  %s143_s0 = inlined_call_operand.vmem [shape: f32[16,32], index: 0, kind: input, shape index: {}]   ;;  %s144_s1 = inlined_call_operand.vmem [shape: s32[16,1], index: 1, kind: input, shape index: {}]   ;;  %s145_s2 = inlined_call_operand.hbm [shape: f32[8,128], index: 2, kind: output, shape index: {}]  }
   0x1   :  { %v12_v0 = vld [vmem:[%s144_s1] sm:$0xff]  ;;  %73 = vset.pattern.permute.xlu0 %v98_v1 }
   0x2   :  { %7 = vsyncpa [#allocation3], 0  ;;  %21 = vperm.xlu0 %73, %v12_v0   ;;  %v13_v2 = vld [vmem:[%s144_s1 + $0x8] sm:$0xff]  ;;  %v16_v3 = vlaneseq  ;;  %v18_v6 = vld [vmem:[%s143_s0] sm:$0xff]  ;;  %v99_v7 = vmov 0.0033333334  }
   0x3   :  { %vm35_vm2 = vcmask 261120   ;;  %v19_v12 = vld [vmem:[%s143_s0 + $0x8] sm:$0xff]  ;;  %vm14_vm4 = vcmp.ne.s32.totalorder %v12_v0, 0  ;;  %vm15_vm5 = vcmp.ne.s32.totalorder %v13_v2, 0  ;;  %vm44_vm6 = vcmask 7168   ;;  %s100_s0 = smov [#allocation2]  }
   0x4   :  { %v17_v4 = vand.u32 127, %v16_v3  ;;  %s62_s16 = sshll.u32 %s100_s0, 4  ;;  %s63_s16 = int_to_ptr.vmem [resolvable:$true] %s62_s16 }
   0x5   :  { %s74_s17 = scalar_lea.vmem %s63_s16, 128  ;;  %p79_p1 = scmp.lt.s32.totalorder %s63_s16, %s63_s16 }
   0x6   :  { %24 = vperm.xlu0 %73, %v13_v2   ;;  %vm30_vm0 = vcmp.eq.s32.totalorder %v17_v4, 0  ;;  %p75_p0 = scmp.ne.s32.totalorder %s63_s16, %s74_s17  ;;  %p80_p2 = scmp.lt.s32.totalorder %s74_s17, %s74_s17 }
   0x8   :  { %p81_p3 = por %p80_p2, %p79_p1 }
   0xa   :  { %p82_p4 = pnand %p81_p3, %p75_p0 }
  0x81   :  { %v22_v5 = vpop.permute.xlu0 %21 }
  0x82   :  { %vm26_vm1 = vcmp.eq.s32.totalorder %v17_v4, %v22_v5 }
  0x83   :  { %v28_v8 = vsel %vm26_vm1, 0.9, %v99_v7 }
  0x84   :  { %v31_v9 = vsel %vm30_vm0, 0.0, %v28_v8 }
  0x85   :  { %v25_v10 = vpop.permute.xlu0 %24  ;;  %v33_v11 = vmul.f32 %v31_v9, %v18_v6 }
  0x86   :  { %vm27_vm3 = vcmp.eq.s32.totalorder %v17_v4, %v25_v10 }
  0x87   :  { %v29_v13 = vsel %vm27_vm3, 0.9, %v99_v7  ;;  %v36_v14 = vsel %vm35_vm2, %v33_v11, 0.0 }
  0x88   :  { %v32_v15 = vsel %vm30_vm0, 0.0, %v29_v13  ;;  %37 = vadd.xlane.f32.xlu1 %v36_v14 }
  0x89   :  { %v34_v16 = vmul.f32 %v32_v15, %v19_v12 }
  0x8b   :  { %v39_v17 = vsel %vm35_vm2, %v34_v16, 0.0 }
  0x8c   :  { %40 = vadd.xlane.f32.xlu1 %v39_v17 }
 0x115   :  { %v38_v18 = vpop.xlane.xlu1 %37 }
 0x116   :  { %v42_v19 = vsel %vm14_vm4, %v38_v18, 0.0 }
 0x117   :  { %v45_v22 = vsel %vm44_vm6, %v42_v19, 0.0 }
 0x119   :  { %v41_v20 = vpop.xlane.xlu1 %40 }
 0x11a   :  { %v43_v21 = vsel %vm15_vm5, %v41_v20, 0.0 }
 0x11b   :  { %v46_v23 = vsel %vm44_vm6, %v43_v21, 0.0 }
 0x11c   :  { %v47_v24 = vadd.f32 %v46_v23, %v45_v22 }
 0x11e   :  { %50 = vperm.xlu0 %73, %v47_v24  }
 0x19d   :  { %v51_v25 = vpop.permute.xlu0 %50 }
 0x19e   :  { %v53_v26 = vsel %vm30_vm0, %v51_v25, 0.0 }
 0x19f   :  { %55 = vst [vmem:[#allocation2] sm:$0xff] %v53_v26 }
 0x1a0   :  { %85 = shalt.err (!%p82_p4)
}
 0x1a1   :  { %s86_s20 = scalar_lea.hbm %s145_s2, 128 }
 0x1a2   :  { %p87_p5 = scmp.ne.s32.totalorder %s145_s2, %s86_s20  ;;  %p90_p6 = scmp.lt.u32.totalorder %s86_s20, %s145_s2 }
 0x1a4   :  { %p92_p7 = pnand %p90_p6, %p87_p5 }
 0x1a6   :  { %95 = shalt.err (!%p92_p7)
}
 0x1a7   :  { %65 = dma.vmem_to_hbm [thread:$0]  %s63_s16, 128, %s145_s2, [#allocation3]  }
 0x1a8   :  { %96 = dma.done.wait [#allocation3], 128  }
 0x1a9   :  { %97 = vsyncadd [#allocation3], 4294967168 }
 0x1aa   :  { %69 = vsyncpa [#allocation3], 1 }

</bundles_post_ra>
